<compile_context>
chip_gen: v5e
topology: v5e:2x2
jax: 0.10.0
libtpu: 0.0.40
codegen_flags: <defaults>
</compile_context>

<pallas_src>
import jax
import jax.numpy as jnp
import numpy as np
from jax.experimental import pallas as pl
from jax.experimental.pallas import tpu as pltpu


def _nearest_index(out_size: int, in_size: int) -> np.ndarray:
    # PyTorch legacy 'nearest': src = (dst * in) // out, clamped to in - 1.
    idx = (np.arange(out_size, dtype=np.int64) * in_size) // out_size
    return np.minimum(idx, in_size - 1).astype(np.int32)


def _selection_matrix(out_size: int, in_size: int) -> np.ndarray:
    idx = _nearest_index(out_size, in_size)
    sel = np.zeros((out_size, in_size), dtype=np.float32)
    sel[np.arange(out_size), idx] = 1.0
    return sel


def _upsample_kernel(x_ref, r_ref, ct_ref, o_ref):
    # x_ref : (C*H_in,  W_in)    one batch element, channels folded into sublanes
    # r_ref : (C*H_out, C*H_in)  block-diagonal one-hot row selection kron(I_C, R)
    # ct_ref: (W_in,   W_out)    pre-transposed one-hot column selection
    # o_ref : (C*H_out, W_out)
    x = x_ref[...]
    r = r_ref[...]
    ct = ct_ref[...]
    if x.dtype != r.dtype:          # static (trace-time) dtype check
        x = x.astype(r.dtype)
    # Row (H) selection for all channels in one matmul; one-hot => exact, so the
    # cast back to the compute dtype is lossless.
    tmp = jnp.dot(r, x, preferred_element_type=jnp.float32).astype(r.dtype)
    # Column (W) selection (already transposed on the host).
    out = jnp.dot(tmp, ct, preferred_element_type=jnp.float32)
    o_ref[...] = out.astype(o_ref.dtype)


def upsample_nearest(x: jax.Array, size) -> jax.Array:
    """Nearest-neighbor upsample of NCHW input `x` to spatial `size`."""
    if isinstance(size, int):
        size = (size, size)
    N, C, H_in, W_in = x.shape
    H_out, W_out = size

    compute_dtype = x.dtype if jnp.issubdtype(x.dtype, jnp.floating) else jnp.float32

    # Host-side constant construction (exact 0/1 matrices in any dtype).
    r_np = _selection_matrix(H_out, H_in)                        # (H_out, H_in)
    r_full_np = np.kron(np.eye(C, dtype=np.float32), r_np)       # (C*H_out, C*H_in)
    ct_np = _selection_matrix(W_out, W_in).T                     # (W_in, W_out)

    r_full = jnp.asarray(r_full_np).astype(compute_dtype)
    ct_sel = jnp.asarray(ct_np).astype(compute_dtype)

    # Free metadata reshape: fold (N, C, H_in) row-major into the sublane axis.
    x2d = x.reshape(N * C * H_in, W_in)

    out2d = pl.pallas_call(
        _upsample_kernel,
        out_shape=jax.ShapeDtypeStruct((N * C * H_out, W_out), x.dtype),
        grid_spec=pltpu.PrefetchScalarGridSpec(
            num_scalar_prefetch=0,
            grid=(N,),
            in_specs=[
                pl.BlockSpec((C * H_in, W_in), lambda n: (n, 0)),
                pl.BlockSpec((C * H_out, C * H_in), lambda n: (0, 0)),  # grid-invariant
                pl.BlockSpec((W_in, W_out), lambda n: (0, 0)),          # grid-invariant
            ],
            out_specs=pl.BlockSpec((C * H_out, W_out), lambda n: (n, 0)),
        ),
        compiler_params=pltpu.CompilerParams(
            dimension_semantics=("parallel",),      # N=2 shards across v7x's 2 TCs
            vmem_limit_bytes=32 * 1024 * 1024,      # explicit; safe on v5e/v6e/v7x
        ),
    )(x2d, r_full, ct_sel)

    return out2d.reshape(N, C, H_out, W_out)


def _reference_upsample_nearest(x: np.ndarray, size) -> np.ndarray:
    if isinstance(size, int):
        size = (size, size)
    H_out, W_out = size
    hi = _nearest_index(H_out, x.shape[2])
    wi = _nearest_index(W_out, x.shape[3])
    return x[:, :, hi][:, :, :, wi]


if __name__ == "__main__":
    key = jax.random.PRNGKey(0)
    N, C, H, W = 2, 4, 16, 16
    size = (24, 28)  # self.size of TestUpsampleModel1

    x = jax.random.normal(key, (N, C, H, W), dtype=jnp.float32)

    out = upsample_nearest(x, size)
    out = jax.block_until_ready(out)

    ref = _reference_upsample_nearest(np.asarray(x), size)
    assert out.shape == ref.shape, (out.shape, ref.shape)
    np.testing.assert_allclose(np.asarray(out), ref, rtol=1e-6, atol=1e-6)

    print("KERNEL_OK")
</pallas_src>

<mosaic_0001>
module attributes {stable_mosaic.version = 11 : i64} {
  func.func @_upsample_kernel(%arg0: i32, %arg1: memref<64x16xf32, #tpu.memory_space<vmem>>, %arg2: memref<96x64xf32, #tpu.memory_space<vmem>>, %arg3: memref<16x28xf32, #tpu.memory_space<vmem>>, %arg4: memref<96x28xf32, #tpu.memory_space<vmem>>) attributes {dimension_semantics = [#tpu.dimension_semantics<parallel>], iteration_bounds = array<i64: 2>, scalar_prefetch = 0 : i64, scratch_operands = 0 : i64, tpu.core_type = #tpu.core_type<tc>, window_params = [{transform_indices = @transform_0, window_bounds = array<i64: 64, 16>}, {pipeline_mode = #tpu.pipeline_mode<synchronous>, transform_indices = @transform_1, window_bounds = array<i64: 96, 64>}, {pipeline_mode = #tpu.pipeline_mode<synchronous>, transform_indices = @transform_2, window_bounds = array<i64: 16, 28>}, {transform_indices = @transform_3, window_bounds = array<i64: 96, 28>}]} {
    %c0 = arith.constant 0 : index
    %c0_0 = arith.constant 0 : index
    %0 = vector.load %arg1[%c0, %c0_0] : memref<64x16xf32, #tpu.memory_space<vmem>>, vector<64x16xf32>
    %c0_1 = arith.constant 0 : index
    %c0_2 = arith.constant 0 : index
    %1 = vector.load %arg2[%c0_1, %c0_2] : memref<96x64xf32, #tpu.memory_space<vmem>>, vector<96x64xf32>
    %c0_3 = arith.constant 0 : index
    %c0_4 = arith.constant 0 : index
    %2 = vector.load %arg3[%c0_3, %c0_4] : memref<16x28xf32, #tpu.memory_space<vmem>>, vector<16x28xf32>
    %cst = arith.constant dense<0.000000e+00> : vector<96x16xf32>
    %3 = tpu.matmul %1, %0, %cst {dimension_numbers = #tpu.dot_dimension_numbers<[1], [0], [0], [1], [0, 0, 1, 1], [], []>} : vector<96x64xf32>, vector<64x16xf32>, vector<96x16xf32> -> vector<96x16xf32>
    %cst_5 = arith.constant dense<0.000000e+00> : vector<96x28xf32>
    %4 = tpu.matmul %3, %2, %cst_5 {dimension_numbers = #tpu.dot_dimension_numbers<[1], [0], [0], [1], [0, 0, 1, 1], [], []>} : vector<96x16xf32>, vector<16x28xf32>, vector<96x28xf32> -> vector<96x28xf32>
    %c0_6 = arith.constant 0 : index
    %c0_7 = arith.constant 0 : index
    %5 = vector.load %arg4[%c0_6, %c0_7] : memref<96x28xf32, #tpu.memory_space<vmem>>, vector<96x28xf32>
    tpu.vector_store %arg4[%c0_6, %c0_7], %4 {strides = array<i32>} : memref<96x28xf32, #tpu.memory_space<vmem>>, vector<96x28xf32>,
    return
  }
  func.func @transform_0(%arg0: i32) -> (i32, i32) {
    %c0_i32 = arith.constant 0 : i32
    %c0_i32_0 = arith.constant 0 : i32
    return %arg0, %c0_i32 : i32, i32
  }
  func.func @transform_1(%arg0: i32) -> (i32, i32) {
    %c0_i32 = arith.constant 0 : i32
    %c0_i32_0 = arith.constant 0 : i32
    %c0_i32_1 = arith.constant 0 : i32
    return %c0_i32, %c0_i32_0 : i32, i32
  }
  func.func @transform_2(%arg0: i32) -> (i32, i32) {
    %c0_i32 = arith.constant 0 : i32
    %c0_i32_0 = arith.constant 0 : i32
    %c0_i32_1 = arith.constant 0 : i32
    return %c0_i32, %c0_i32_0 : i32, i32
  }
  func.func @transform_3(%arg0: i32) -> (i32, i32) {
    %c0_i32 = arith.constant 0 : i32
    %c0_i32_0 = arith.constant 0 : i32
    return %arg0, %c0_i32 : i32, i32
  }
}

</mosaic_0001>

<bundles_post_ra>
// kernel: tpu_custom_call.1
= control target key start
LH: loop header
LB: loop body
LE: loop exit
PB: predicated region body
PF: predicated region fallthrough
CT: control target
= control target key end

     0   :  { %s525_s12 = smov 0   ;;  %s624_s0 = inlined_call_operand.vmem [shape: f32[128,16], index: 0, kind: input, shape index: {}]   ;;  %s625_s1 = inlined_call_operand.vmem [shape: f32[96,64], index: 1, kind: input, shape index: {}]   ;;  %s626_s2 = inlined_call_operand.vmem [shape: f32[16,28], index: 2, kind: input, shape index: {}]   ;;  %s627_s3 = inlined_call_operand.vmem [shape: f32[192,28], index: 3, kind: output, shape index: {}]  }
   0x1 LB: > { %s445_s13 = sadd.s32 4294967295, %s503_s12   ;;  %p449_p0 = scmp.ge.s32.totalorder %s503_s12, 1  ;;  %s503_s12 = sphi %s525_s12, %s13_s12  }
   0x2   : > { %p138_p1 = scmp.lt.s32.totalorder %s503_s12, 3 }
   0x4   : > { %p139_p2 = pnand %p449_p0, %p138_p1 }
   0x5   : > { %s450_s14 = sshll.u32 (!%p139_p2), %s445_s13, 3  ;;  %s168_s22 = smul.u32 (!%p139_p2), 12, %s445_s13 }
   0x6   : > { %142 = sbr.rel (%p139_p2) target bundleno = 335 (0x14f), region = 32  ;;  %p163_p3 = scmp.lt.s32.totalorder (!%p139_p2), %s450_s14, 15 }
   0x7   : > { %p169_p4 = scmp.lt.s32.totalorder (!%p139_p2), %s168_s22, 23 }
   0xb   : > { %s629_s14 = smov (!%p163_p3, %s450_s14), 15  ;;  %v182_v8 = vld [vmem:[%s625_s1] sm:$0xff]  ;;  %vm196_vm0 = vcmask 523264   ;;  %v188_v9 = vld [vmem:[%s625_s1 + $0x30] sm:$0xff]  ;;  %v183_v10 = vld [vmem:[%s625_s1 + $0x8] sm:$0xff]  ;;  %vm286_vm1 = vcmask 130048  }
   0xc   : > { %s451_s15 = sshll.u32 %s629_s14, 3  ;;  %v189_v11 = vld [vmem:[%s625_s1 + $0x38] sm:$0xff]  ;;  %v195_v12 = vld [vmem:[%s626_s2 + $0x8] sm:$0xff]  ;;  %v184_v13 = vld [vmem:[%s625_s1 + $0x10] sm:$0xff]  ;;  %s631_s22 = smov (!%p169_p4, %s168_s22), 23  ;;  %vm376_vm2 = vcmask 228352  }
   0xd   : > { %s166_s18 = scalar_lea.vmem %s624_s0, %s451_s15  ;;  %337 = vmatpush.msra.mxu1 %v195_v12  ;;  %487 = vmatpush.msra.mxu3 %v195_v12  ;;  %v190_v14 = vld [vmem:[%s625_s1 + $0x40] sm:$0xff]  ;;  %v185_v15 = vld [vmem:[%s625_s1 + $0x18] sm:$0xff]  ;;  %v191_v16 = vld [vmem:[%s625_s1 + $0x48] sm:$0xff]  ;;  %s452_s23 = sshll.u32 %s631_s22, 3 }
   0xe   : > { %v181_v0 = vld [vmem:[%s166_s18 + $0x38] sm:$0xff]  ;;  %v180_v1 = vld [vmem:[%s166_s18 + $0x30] sm:$0xff]  ;;  %v179_v2 = vld [vmem:[%s166_s18 + $0x28] sm:$0xff]  ;;  %s172_s26 = scalar_lea.vmem %s627_s3, %s452_s23 }
   0xf   : > { %241 = vmatpush.msra.mxu0 %v181_v0  ;;  %479 = vmatpush.msra.mxu2 %v181_v0  ;;  %v178_v3 = vld [vmem:[%s166_s18 + $0x20] sm:$0xff]  ;;  %v177_v4 = vld [vmem:[%s166_s18 + $0x18] sm:$0xff]  ;;  %v176_v5 = vld [vmem:[%s166_s18 + $0x10] sm:$0xff] }
  0x10   : > { %v175_v6 = vld [vmem:[%s166_s18 + $0x8] sm:$0xff]  ;;  %v174_v7 = vld [vmem:[%s166_s18] sm:$0xff]  ;;  %v192_v18 = vld [vmem:[%s625_s1 + $0x50] sm:$0xff] }
  0x11   : > { %242 = vmatpush.msra.mxu0 %v180_v1  ;;  %480 = vmatpush.msra.mxu2 %v180_v1  ;;  %v186_v17 = vld [vmem:[%s625_s1 + $0x20] sm:$0xff]  ;;  %v187_v19 = vld [vmem:[%s625_s1 + $0x28] sm:$0xff]  ;;  %v193_v20 = vld [vmem:[%s625_s1 + $0x58] sm:$0xff] }
  0x12   : > { %v194_v21 = vld [vmem:[%s626_s2] sm:$0xff] }
  0x13   : > { %243 = vmatpush.msra.mxu0 %v179_v2  ;;  %481 = vmatpush.msra.mxu2 %v179_v2 }
  0x14   : > { %338 = vmatpush.msra.mxu1 %v194_v21  ;;  %488 = vmatpush.msra.mxu3 %v194_v21 }
  0x15   : > { %244 = vmatpush.msra.mxu0 %v178_v3  ;;  %482 = vmatpush.msra.mxu2 %v178_v3 }
  0x17   : > { %245 = vmatpush.msra.mxu0 %v177_v4  ;;  %483 = vmatpush.msra.mxu2 %v177_v4 }
  0x19   : > { %246 = vmatpush.msra.mxu0 %v176_v5  ;;  %484 = vmatpush.msra.mxu2 %v176_v5 }
  0x1b   : > { %247 = vmatpush.msra.mxu0 %v175_v6  ;;  %485 = vmatpush.msra.mxu2 %v175_v6 }
  0x1d   : > { %248 = vmatpush.msra.mxu0 %v174_v7  ;;  %486 = vmatpush.msra.mxu2 %v174_v7 }
  0x1e   : > { %453 = vmatmul.msk.f32.vlgmr.msra.gmra.mxu0 %vm196_vm0, %v182_v8  ;;  %459 = vmatmul.msk.f32.vlgmr.msra.gmra.mxu2 %vm196_vm0, %v188_v9 }
  0x26   : > { %454 = vmatmul.msk.f32.gmra.mxu0 %vm196_vm0, %v183_v10  ;;  %460 = vmatmul.msk.f32.gmra.mxu2 %vm196_vm0, %v189_v11 }
  0x2e   : > { %455 = vmatmul.msk.f32.gmra.mxu0 %vm196_vm0, %v184_v13  ;;  %461 = vmatmul.msk.f32.gmra.mxu2 %vm196_vm0, %v190_v14 }
  0x36   : > { %456 = vmatmul.msk.f32.gmra.mxu0 %vm196_vm0, %v185_v15  ;;  %462 = vmatmul.msk.f32.gmra.mxu2 %vm196_vm0, %v191_v16 }
  0x3e   : > { %457 = vmatmul.msk.f32.gmra.mxu0 %vm196_vm0, %v186_v17  ;;  %463 = vmatmul.msk.f32.gmra.mxu2 %vm196_vm0, %v192_v18 }
  0x46   : > { %458 = vmatmul.msk.f32.gmra.mxu0 %vm196_vm0, %v187_v19  ;;  %464 = vmatmul.msk.f32.gmra.mxu2 %vm196_vm0, %v193_v20 }
  0x9b   : > { %v250_v22 = vpop.f32.mrf.mxu0 }
  0x9c   : > { %465 = vmatmul.msk.f32.vlgmr.msra.gmra.mxu1 %vm286_vm1, %v250_v22 }
  0xa1   : > { %v268_v23 = vpop.f32.mrf.mxu2 }
  0xa3   : > { %v253_v24 = vpop.f32.mrf.mxu0 }
  0xa4   : > { %466 = vmatmul.msk.f32.gmra.mxu1 %vm286_vm1, %v253_v24 }
  0xa9   : > { %v271_v25 = vpop.f32.mrf.mxu2 }
  0xaa   : > { %472 = vmatmul.msk.f32.vlgmr.msra.gmra.mxu3 %vm286_vm1, %v271_v25 }
  0xab   : > { %v256_v26 = vpop.f32.mrf.mxu0 }
  0xac   : > { %467 = vmatmul.msk.f32.gmra.mxu1 %vm286_vm1, %v256_v26 }
  0xb1   : > { %v274_v27 = vpop.f32.mrf.mxu2 }
  0xb2   : > { %473 = vmatmul.msk.f32.gmra.mxu3 %vm286_vm1, %v274_v27 }
  0xb3   : > { %v259_v28 = vpop.f32.mrf.mxu0 }
  0xb4   : > { %468 = vmatmul.msk.f32.gmra.mxu1 %vm286_vm1, %v259_v28 }
  0xb9   : > { %v277_v29 = vpop.f32.mrf.mxu2 }
  0xba   : > { %474 = vmatmul.msk.f32.gmra.mxu3 %vm286_vm1, %v277_v29 }
  0xbb   : > { %v262_v30 = vpop.f32.mrf.mxu0 }
  0xbc   : > { %469 = vmatmul.msk.f32.gmra.mxu1 %vm286_vm1, %v262_v30 }
  0xc1   : > { %v280_v31 = vpop.f32.mrf.mxu2 }
  0xc2   : > { %475 = vmatmul.msk.f32.gmra.mxu3 %vm286_vm1, %v280_v31 }
  0xc3   : > { %v265_v32 = vpop.f32.mrf.mxu0 }
  0xc4   : > { %470 = vmatmul.msk.f32.gmra.mxu1 %vm286_vm1, %v265_v32 }
  0xc9   : > { %v283_v33 = vpop.f32.mrf.mxu2 }
  0xca   : > { %476 = vmatmul.msk.f32.gmra.mxu3 %vm286_vm1, %v283_v33 }
  0xcc   : > { %471 = vmatmul.msk.f32.gmra.mxu1 %vm286_vm1, %v268_v23 }
 0x119   : > { %v340_v34 = vpop.f32.mrf.mxu1 }
 0x11a   : > { %377 = vst.msk [vmem:[%s172_s26] sm:$0xff] %vm376_vm2, %v340_v34 }
 0x121   : > { %v343_v35 = vpop.f32.mrf.mxu1 }
 0x122   : > { %378 = vst.msk [vmem:[%s172_s26 + $0x8] sm:$0xff] %vm376_vm2, %v343_v35 }
 0x129   : > { %v346_v36 = vpop.f32.mrf.mxu1 }
 0x12a   : > { %379 = vst.msk [vmem:[%s172_s26 + $0x10] sm:$0xff] %vm376_vm2, %v346_v36 }
 0x12d   : > { %v361_v37 = vpop.f32.mrf.mxu3 }
 0x12e   : > { %384 = vst.msk [vmem:[%s172_s26 + $0x38] sm:$0xff] %vm376_vm2, %v361_v37 }
 0x131   : > { %v349_v38 = vpop.f32.mrf.mxu1 }
 0x132   : > { %380 = vst.msk [vmem:[%s172_s26 + $0x18] sm:$0xff] %vm376_vm2, %v349_v38 }
 0x135   : > { %v364_v39 = vpop.f32.mrf.mxu3 }
 0x136   : > { %385 = vst.msk [vmem:[%s172_s26 + $0x40] sm:$0xff] %vm376_vm2, %v364_v39 }
 0x139   : > { %v352_v40 = vpop.f32.mrf.mxu1 }
 0x13a   : > { %381 = vst.msk [vmem:[%s172_s26 + $0x20] sm:$0xff] %vm376_vm2, %v352_v40 }
 0x13d   : > { %v367_v41 = vpop.f32.mrf.mxu3 }
 0x13e   : > { %386 = vst.msk [vmem:[%s172_s26 + $0x48] sm:$0xff] %vm376_vm2, %v367_v41 }
 0x141   : > { %v355_v42 = vpop.f32.mrf.mxu1 }
 0x142   : > { %382 = vst.msk [vmem:[%s172_s26 + $0x28] sm:$0xff] %vm376_vm2, %v355_v42 }
 0x145   : > { %v370_v43 = vpop.f32.mrf.mxu3 }
 0x146   : > { %387 = vst.msk [vmem:[%s172_s26 + $0x50] sm:$0xff] %vm376_vm2, %v370_v43 }
 0x149   : > { %v358_v44 = vpop.f32.mrf.mxu1 }
 0x14a   : > { %383 = vst.msk [vmem:[%s172_s26 + $0x30] sm:$0xff] %vm376_vm2, %v358_v44 }
 0x14d   : > { %v373_v45 = vpop.f32.mrf.mxu3 }
 0x14e   : > { %388 = vst.msk [vmem:[%s172_s26 + $0x58] sm:$0xff] %vm376_vm2, %v373_v45 }
 0x14f PF: > { %s13_s12 = sadd.s32 1, %s503_s12  }
 0x150   : > { %p10_p5 = scmp.ge.s32.totalorder %s13_s12, 4  }
 0x152   :  { %12 = sbr.rel (!%p10_p5) target bundleno = 1 (0x1), region = 62 }

</bundles_post_ra>
